<compile_context>
chip_gen: v5e
topology: v5e:2x2
jax: 0.10.0
libtpu: 0.0.40
codegen_flags: <defaults>
</compile_context>

<pallas_src>
import functools

import jax
import jax.numpy as jnp
from jax import lax
from jax.experimental import pallas as pl
from jax.experimental.pallas import tpu as pltpu


def _round_up(x: int, m: int) -> int:
    return (x + m - 1) // m * m


def _largest_divisor(n: int, mult: int, limit: int) -> int:
    """Largest multiple of `mult` that divides `n` and is <= limit (at least `mult`)."""
    best = mult
    d = mult
    cap = min(n, max(limit, mult))
    while d <= cap:
        if n % d == 0:
            best = d
        d += mult
    return best


def _contrastive_kernel(emb_q_ref, emb_k_ref, lab_q_ref, lab_k_ref, diag_ref,  # inputs
                        out_ref,                                               # output
                        er_sc, m_sc, l_sc, s_sc, c_sc,                         # scratch
                        *, inv_temp, pad_count, matmul_dtype, track_max):
    j = pl.program_id(1)               # key (column) tile index — reduction axis

    @pl.when(j == 0)
    def _init():
        # 1/T folded into the anchor operand once per row tile (resident across j),
        # including the (optional) bf16 cast — not redone every column step.
        er_sc[...] = (emb_q_ref[...].astype(jnp.float32) * inv_temp).astype(matmul_dtype)
        if track_max:
            m_sc[...] = jnp.full_like(m_sc, -jnp.inf)
        l_sc[...] = jnp.zeros_like(l_sc)
        s_sc[...] = jnp.zeros_like(s_sc)
        c_sc[...] = jnp.zeros_like(c_sc)

    ec = emb_k_ref[...]
    if ec.dtype != matmul_dtype:
        ec = ec.astype(matmul_dtype)

    # sim[k, q] = e_k . e_q / T — anchors on the lane axis, keys on the sublane axis.
    # Gram contraction over D of both operands: no transpose feeding the MXU.
    sim = lax.dot_general(ec, er_sc[...],
                          dimension_numbers=(((1,), (1,)), ((), ())),
                          preferred_element_type=jnp.float32)          # [TK, TQ] f32

    # Positive mask: label equality only.  Self-pair and padded key rows are removed
    # exactly at finalize, so the hot loop carries no iota / padding masks.
    pos = lab_k_ref[...] == lab_q_ref[...]                              # [TK, TQ] bool
    mask = jnp.where(pos, 1.0, 0.0)

    if track_max:
        # Online logsumexp over key tiles; reductions run along the sublane axis and
        # land directly in the lane-dense (1, TQ) accumulators.
        m_prev = m_sc[...]
        m_new = jnp.maximum(m_prev, jnp.max(sim, axis=0, keepdims=True))
        alpha = jnp.exp(m_prev - m_new)
        l_sc[...] = alpha * l_sc[...] + jnp.sum(jnp.exp(sim - m_new),
                                                axis=0, keepdims=True)
        m_sc[...] = m_new
    else:
        # Unstabilized sum-exp (valid for bounded logits, e.g. L2-normalized inputs).
        l_sc[...] += jnp.sum(jnp.exp(sim), axis=0, keepdims=True)

    s_sc[...] += jnp.sum(mask * sim, axis=0, keepdims=True)
    c_sc[...] += jnp.sum(mask, axis=0, keepdims=True)

    @pl.when(j == pl.num_programs(1) - 1)
    def _finalize():
        l = l_sc[...]
        if track_max:
            m = m_sc[...]
            if pad_count:
                # Padded key rows are exactly zero => their sim is exactly 0; remove
                # their pad_count * exp(0 - m) contribution from the denominator.
                l = l - float(pad_count) * jnp.exp(-m)
            lse = m + jnp.log(l)
        else:
            if pad_count:
                l = l - float(pad_count)
            lse = jnp.log(l)
        # Exclude the self-pair from the positive set (exact finalize correction).
        s = s_sc[...] - diag_ref[...]
        c = c_sc[...] - 1.0
        denom = jnp.maximum(c, 1.0)                                     # clamp(min=1)
        out_ref[...] = ((s - c * lse) / denom)[None]                    # (1, 1, TQ)


def contrastive_loss(embeddings: jnp.ndarray, labels: jnp.ndarray,
                     temperature: float = 0.07, *,
                     tile_q: int = 1024, tile_k: int = 512,
                     use_bf16_matmul: bool = False,
                     stable_lse: bool = True) -> jnp.ndarray:
    """Supervised contrastive loss matching the PyTorch ContrastiveLoss module.

    use_bf16_matmul: feed bf16 tiles to the MXU (f32 accumulation) — ~4x MXU
        throughput and half the DMA bytes on v6e/v7x, but 1/temperature amplifies
        operand rounding, so validate per model before enabling.
    stable_lse: max-tracked online logsumexp.  Set False for L2-normalized
        embeddings (|sim| <= 1/T keeps exp in f32 range); drops one reduction and
        one VPU pass per step and matches the unstabilized reference exactly.
    """
    n, d = embeddings.shape
    inv_temp = float(1.0 / temperature)
    lane = 128

    # ---- tile selection (both tiles are multiples of 128 and divide n_pad) ----
    n_pad = _round_up(n, lane)
    tk = _largest_divisor(n_pad, lane, tile_k)                  # streamed key tile
    # Anchor tile as large as allowed, but keep >= 2 row tiles when possible so both
    # v7x TensorCores receive work on the "parallel" row axis.
    tq_cap = min(tile_q, n_pad // 2) if n_pad >= 2 * lane else min(tile_q, n_pad)
    tq = _largest_divisor(n_pad, lane, tq_cap)

    store_dtype = jnp.bfloat16 if use_bf16_matmul else jnp.float32

    emb = embeddings.astype(store_dtype)
    lab = labels.reshape(-1).astype(jnp.int32)
    if n_pad != n:
        emb = jnp.pad(emb, ((0, n_pad - n), (0, 0)))            # zero rows => sim == 0
        lab = jnp.pad(lab, (0, n_pad - n), constant_values=-1)

    # Labels supplied in both orientations so the equality mask broadcasts with no
    # in-kernel transpose; diagonal similarities precomputed once (O(N*D), trivial).
    lab_row = lab.reshape(1, n_pad)                             # anchors on lanes
    lab_col = lab.reshape(n_pad, 1)                             # keys on sublanes
    emb_f32 = emb.astype(jnp.float32)
    diag_row = (jnp.sum(emb_f32 * emb_f32, axis=1) * inv_temp).reshape(1, n_pad)

    grid = (n_pad // tq, n_pad // tk)

    # ---- explicit VMEM budget (v5e scoped default 16 MiB; v7x physical 64 MiB) ----
    isz = jnp.dtype(store_dtype).itemsize
    vmem_est = (2 * tq * d * isz + 2 * tk * d * isz             # double-buffered emb tiles
                + tq * d * isz                                  # cached scaled anchors
                + 8 * tk * tq * 4                               # sim / exp / mask temporaries
                + 64 * tq * 4 + (2 << 20))                      # accumulators + headroom
    vmem_limit = int(min(max(vmem_est, 32 << 20), 64 << 20))

    kernel = functools.partial(
        _contrastive_kernel,
        inv_temp=inv_temp,
        pad_count=n_pad - n,
        matmul_dtype=store_dtype,
        track_max=stable_lse)

    out = pl.pallas_call(
        kernel,
        out_shape=jax.ShapeDtypeStruct((grid[0], 1, tq), jnp.float32),
        grid_spec=pltpu.PrefetchScalarGridSpec(
            num_scalar_prefetch=0,
            grid=grid,
            in_specs=[
                pl.BlockSpec((tq, d), lambda i, j: (i, 0)),     # anchor rows (resident over j)
                pl.BlockSpec((tk, d), lambda i, j: (j, 0)),     # key rows (streamed)
                pl.BlockSpec((1, tq), lambda i, j: (0, i)),     # anchor labels [1, TQ]
                pl.BlockSpec((tk, 1), lambda i, j: (j, 0)),     # key labels    [TK, 1]
                pl.BlockSpec((1, tq), lambda i, j: (0, i)),     # diagonal sims [1, TQ]
            ],
            out_specs=pl.BlockSpec((1, 1, tq), lambda i, j: (i, 0, 0)),
            scratch_shapes=[
                pltpu.VMEM((tq, d), store_dtype),               # cached scaled anchor tile
                pltpu.VMEM((1, tq), jnp.float32),               # m (running max)
                pltpu.VMEM((1, tq), jnp.float32),               # l (running sum-exp)
                pltpu.VMEM((1, tq), jnp.float32),               # s (masked sim sum)
                pltpu.VMEM((1, tq), jnp.float32),               # c (positive count)
            ]),
        compiler_params=pltpu.CompilerParams(
            dimension_semantics=("parallel", "arbitrary"),
            vmem_limit_bytes=vmem_limit),
    )(emb, emb, lab_row, lab_col, diag_row)

    # Trivial N -> 1 reduction kept in XLA so the anchor grid axis stays parallel.
    per_anchor = out.reshape(n_pad)[:n]
    return -jnp.mean(per_anchor)


def _reference(embeddings, labels, temperature=0.07):
    emb = embeddings.astype(jnp.float32)
    sim = (emb @ emb.T) / temperature
    lab = labels.reshape(-1, 1)
    mask = (lab == lab.T).astype(jnp.float32) - jnp.eye(emb.shape[0], dtype=jnp.float32)
    log_prob = sim - jnp.log(jnp.sum(jnp.exp(sim), axis=1, keepdims=True))
    mean_log_prob = jnp.sum(mask * log_prob, axis=1) / jnp.clip(jnp.sum(mask, axis=1), 1.0)
    return -jnp.mean(mean_log_prob)


if __name__ == "__main__":
    key = jax.random.PRNGKey(0)
    k1, k2, k3, k4 = jax.random.split(key, 4)

    # --- small case: single (128, 128) tile, heavy row/column padding ---
    N1, D1 = 8, 32
    emb1 = jax.random.normal(k1, (N1, D1), dtype=jnp.float32)
    emb1 = emb1 / jnp.linalg.norm(emb1, axis=1, keepdims=True)
    lab1 = jax.random.randint(k2, (N1,), 0, 3, dtype=jnp.int32)
    loss1 = jax.block_until_ready(contrastive_loss(emb1, lab1, temperature=0.07))
    ref1 = _reference(emb1, lab1, temperature=0.07)
    assert jnp.allclose(loss1, ref1, rtol=1e-3, atol=1e-3), (loss1, ref1)

    # --- tiled + padded case: forced (3, 3) grid, multi-step online LSE ---
    N2, D2 = 300, 64
    emb2 = jax.random.normal(k3, (N2, D2), dtype=jnp.float32)
    emb2 = emb2 / jnp.linalg.norm(emb2, axis=1, keepdims=True)
    lab2 = jax.random.randint(k4, (N2,), 0, 5, dtype=jnp.int32)
    loss2 = jax.block_until_ready(
        contrastive_loss(emb2, lab2, temperature=0.07, tile_q=128, tile_k=128))
    ref2 = _reference(emb2, lab2, temperature=0.07)
    assert jnp.allclose(loss2, ref2, rtol=1e-3, atol=1e-3), (loss2, ref2)

    # --- default tiles (tq != tk), bf16 MXU operands + unstabilized-LSE fast path ---
    loss3 = jax.block_until_ready(
        contrastive_loss(emb2, lab2, temperature=0.07,
                         use_bf16_matmul=True, stable_lse=False))
    assert jnp.allclose(loss3, ref2, rtol=5e-2, atol=5e-2), (loss3, ref2)

    print("KERNEL_OK")
</pallas_src>

<mosaic_0001>
module attributes {stable_mosaic.version = 11 : i64} {
  func.func @_contrastive_kernel(%arg0: i32, %arg1: i32, %arg2: memref<128x32xf32, #tpu.memory_space<vmem>>, %arg3: memref<128x32xf32, #tpu.memory_space<vmem>>, %arg4: memref<1x128xi32, #tpu.memory_space<vmem>>, %arg5: memref<128x1xi32, #tpu.memory_space<vmem>>, %arg6: memref<1x128xf32, #tpu.memory_space<vmem>>, %arg7: memref<1x1x128xf32, #tpu.memory_space<vmem>>, %arg8: memref<128x32xf32, #tpu.memory_space<vmem>>, %arg9: memref<1x128xf32, #tpu.memory_space<vmem>>, %arg10: memref<1x128xf32, #tpu.memory_space<vmem>>, %arg11: memref<1x128xf32, #tpu.memory_space<vmem>>, %arg12: memref<1x128xf32, #tpu.memory_space<vmem>>) attributes {dimension_semantics = [#tpu.dimension_semantics<parallel>, #tpu.dimension_semantics<arbitrary>], iteration_bounds = array<i64: 1, 1>, scalar_prefetch = 0 : i64, scratch_operands = 5 : i64, tpu.core_type = #tpu.core_type<tc>, window_params = [{transform_indices = @transform_0, window_bounds = array<i64: 128, 32>}, {transform_indices = @transform_1, window_bounds = array<i64: 128, 32>}, {transform_indices = @transform_2, window_bounds = array<i64: 1, 128>}, {transform_indices = @transform_3, window_bounds = array<i64: 128, 1>}, {transform_indices = @transform_4, window_bounds = array<i64: 1, 128>}, {transform_indices = @transform_5, window_bounds = array<i64: 1, 1, 128>}]} {
    %c0_i32 = arith.constant 0 : i32
    %0 = arith.cmpi eq, %arg1, %c0_i32 : i32
    %1 = arith.extui %0 : i1 to i32
    %c0_i32_0 = arith.constant 0 : i32
    %2 = arith.cmpi ne, %1, %c0_i32_0 : i32
    scf.if %2 {
      %c0_32 = arith.constant 0 : index
      %c0_33 = arith.constant 0 : index
      %44 = vector.load %arg2[%c0_32, %c0_33] : memref<128x32xf32, #tpu.memory_space<vmem>>, vector<128x32xf32>
      %cst_34 = arith.constant 14.2857141 : f32
      %45 = vector.broadcast %cst_34 : f32 to vector<128x32xf32>
      %46 = arith.mulf %44, %45 : vector<128x32xf32>
      %c0_35 = arith.constant 0 : index
      %c0_36 = arith.constant 0 : index
      %47 = vector.load %arg8[%c0_35, %c0_36] : memref<128x32xf32, #tpu.memory_space<vmem>>, vector<128x32xf32>
      tpu.vector_store %arg8[%c0_35, %c0_36], %46 {strides = array<i32>} : memref<128x32xf32, #tpu.memory_space<vmem>>, vector<128x32xf32>,
      %cst_37 = arith.constant 0xFF800000 : f32
      %48 = vector.broadcast %cst_37 : f32 to vector<1x128xf32>
      %c0_38 = arith.constant 0 : index
      %c0_39 = arith.constant 0 : index
      %49 = vector.load %arg9[%c0_38, %c0_39] : memref<1x128xf32, #tpu.memory_space<vmem>>, vector<1x128xf32>
      tpu.vector_store %arg9[%c0_38, %c0_39], %48 {strides = array<i32>} : memref<1x128xf32, #tpu.memory_space<vmem>>, vector<1x128xf32>,
      %cst_40 = arith.constant 0.000000e+00 : f32
      %50 = vector.broadcast %cst_40 : f32 to vector<1x128xf32>
      %c0_41 = arith.constant 0 : index
      %c0_42 = arith.constant 0 : index
      %51 = vector.load %arg10[%c0_41, %c0_42] : memref<1x128xf32, #tpu.memory_space<vmem>>, vector<1x128xf32>
      tpu.vector_store %arg10[%c0_41, %c0_42], %50 {strides = array<i32>} : memref<1x128xf32, #tpu.memory_space<vmem>>, vector<1x128xf32>,
      %cst_43 = arith.constant 0.000000e+00 : f32
      %52 = vector.broadcast %cst_43 : f32 to vector<1x128xf32>
      %c0_44 = arith.constant 0 : index
      %c0_45 = arith.constant 0 : index
      %53 = vector.load %arg11[%c0_44, %c0_45] : memref<1x128xf32, #tpu.memory_space<vmem>>, vector<1x128xf32>
      tpu.vector_store %arg11[%c0_44, %c0_45], %52 {strides = array<i32>} : memref<1x128xf32, #tpu.memory_space<vmem>>, vector<1x128xf32>,
      %cst_46 = arith.constant 0.000000e+00 : f32
      %54 = vector.broadcast %cst_46 : f32 to vector<1x128xf32>
      %c0_47 = arith.constant 0 : index
      %c0_48 = arith.constant 0 : index
      %55 = vector.load %arg12[%c0_47, %c0_48] : memref<1x128xf32, #tpu.memory_space<vmem>>, vector<1x128xf32>
      tpu.vector_store %arg12[%c0_47, %c0_48], %54 {strides = array<i32>} : memref<1x128xf32, #tpu.memory_space<vmem>>, vector<1x128xf32>,
    } else {
    }
    %c0 = arith.constant 0 : index
    %c0_1 = arith.constant 0 : index
    %3 = vector.load %arg3[%c0, %c0_1] : memref<128x32xf32, #tpu.memory_space<vmem>>, vector<128x32xf32>
    %c0_2 = arith.constant 0 : index
    %c0_3 = arith.constant 0 : index
    %4 = vector.load %arg8[%c0_2, %c0_3] : memref<128x32xf32, #tpu.memory_space<vmem>>, vector<128x32xf32>
    %cst = arith.constant dense<0.000000e+00> : vector<128x128xf32>
    %5 = tpu.matmul %3, %4, %cst {dimension_numbers = #tpu.dot_dimension_numbers<[1], [1], [0], [0], [0, 0, 1, 0], [], []>} : vector<128x32xf32>, vector<128x32xf32>, vector<128x128xf32> -> vector<128x128xf32>
    %c0_4 = arith.constant 0 : index
    %c0_5 = arith.constant 0 : index
    %6 = vector.load %arg5[%c0_4, %c0_5] : memref<128x1xi32, #tpu.memory_space<vmem>>, vector<128x1xi32>
    %c0_6 = arith.constant 0 : index
    %c0_7 = arith.constant 0 : index
    %7 = vector.load %arg4[%c0_6, %c0_7] : memref<1x128xi32, #tpu.memory_space<vmem>>, vector<1x128xi32>
    %8 = vector.broadcast %6 : vector<128x1xi32> to vector<128x128xi32>
    %9 = vector.broadcast %7 : vector<1x128xi32> to vector<128x128xi32>
    %10 = arith.cmpi eq, %8, %9 : vector<128x128xi32>
    %cst_8 = arith.constant 1.000000e+00 : f32
    %cst_9 = arith.constant 0.000000e+00 : f32
    %11 = vector.broadcast %cst_8 : f32 to vector<128x128xf32>
    %12 = vector.broadcast %cst_9 : f32 to vector<128x128xf32>
    %13 = arith.select %10, %11, %12 : vector<128x128xi1>, vector<128x128xf32>
    %c0_10 = arith.constant 0 : index
    %c0_11 = arith.constant 0 : index
    %14 = vector.load %arg9[%c0_10, %c0_11] : memref<1x128xf32, #tpu.memory_space<vmem>>, vector<1x128xf32>
    %cst_12 = arith.constant dense<0xFF800000> : vector<128xf32>
    %15 = vector.multi_reduction <maximumf>, %5, %cst_12 [0] : vector<128x128xf32> to vector<128xf32>
    %16 = vector.shape_cast %15 : vector<128xf32> to vector<1x128xf32>
    %17 = arith.maximumf %14, %16 : vector<1x128xf32>
    %18 = arith.subf %14, %17 : vector<1x128xf32>
    %19 = math.exp %18 : vector<1x128xf32>
    %c0_13 = arith.constant 0 : index
    %c0_14 = arith.constant 0 : index
    %20 = vector.load %arg10[%c0_13, %c0_14] : memref<1x128xf32, #tpu.memory_space<vmem>>, vector<1x128xf32>
    %21 = arith.mulf %19, %20 : vector<1x128xf32>
    %22 = vector.broadcast %17 : vector<1x128xf32> to vector<128x128xf32>
    %23 = arith.subf %5, %22 : vector<128x128xf32>
    %24 = math.exp %23 : vector<128x128xf32>
    %cst_15 = arith.constant dense<0.000000e+00> : vector<128xf32>
    %25 = vector.multi_reduction <add>, %24, %cst_15 [0] : vector<128x128xf32> to vector<128xf32>
    %26 = vector.shape_cast %25 : vector<128xf32> to vector<1x128xf32>
    %27 = arith.addf %21, %26 : vector<1x128xf32>
    %c0_16 = arith.constant 0 : index
    %c0_17 = arith.constant 0 : index
    %28 = vector.load %arg10[%c0_16, %c0_17] : memref<1x128xf32, #tpu.memory_space<vmem>>, vector<1x128xf32>
    tpu.vector_store %arg10[%c0_16, %c0_17], %27 {strides = array<i32>} : memref<1x128xf32, #tpu.memory_space<vmem>>, vector<1x128xf32>,
    %c0_18 = arith.constant 0 : index
    %c0_19 = arith.constant 0 : index
    %29 = vector.load %arg9[%c0_18, %c0_19] : memref<1x128xf32, #tpu.memory_space<vmem>>, vector<1x128xf32>
    tpu.vector_store %arg9[%c0_18, %c0_19], %17 {strides = array<i32>} : memref<1x128xf32, #tpu.memory_space<vmem>>, vector<1x128xf32>,
    %c0_20 = arith.constant 0 : index
    %c0_21 = arith.constant 0 : index
    %30 = vector.load %arg11[%c0_20, %c0_21] : memref<1x128xf32, #tpu.memory_space<vmem>>, vector<1x128xf32>
    %31 = arith.mulf %13, %5 : vector<128x128xf32>
    %cst_22 = arith.constant dense<0.000000e+00> : vector<128xf32>
    %32 = vector.multi_reduction <add>, %31, %cst_22 [0] : vector<128x128xf32> to vector<128xf32>
    %33 = vector.shape_cast %32 : vector<128xf32> to vector<1x128xf32>
    %34 = arith.addf %30, %33 : vector<1x128xf32>
    %c0_23 = arith.constant 0 : index
    %c0_24 = arith.constant 0 : index
    %35 = vector.load %arg11[%c0_23, %c0_24] : memref<1x128xf32, #tpu.memory_space<vmem>>, vector<1x128xf32>
    tpu.vector_store %arg11[%c0_23, %c0_24], %34 {strides = array<i32>} : memref<1x128xf32, #tpu.memory_space<vmem>>, vector<1x128xf32>,
    %c0_25 = arith.constant 0 : index
    %c0_26 = arith.constant 0 : index
    %36 = vector.load %arg12[%c0_25, %c0_26] : memref<1x128xf32, #tpu.memory_space<vmem>>, vector<1x128xf32>
    %cst_27 = arith.constant dense<0.000000e+00> : vector<128xf32>
    %37 = vector.multi_reduction <add>, %13, %cst_27 [0] : vector<128x128xf32> to vector<128xf32>
    %38 = vector.shape_cast %37 : vector<128xf32> to vector<1x128xf32>
    %39 = arith.addf %36, %38 : vector<1x128xf32>
    %c0_28 = arith.constant 0 : index
    %c0_29 = arith.constant 0 : index
    %40 = vector.load %arg12[%c0_28, %c0_29] : memref<1x128xf32, #tpu.memory_space<vmem>>, vector<1x128xf32>
    tpu.vector_store %arg12[%c0_28, %c0_29], %39 {strides = array<i32>} : memref<1x128xf32, #tpu.memory_space<vmem>>, vector<1x128xf32>,
    %c0_i32_30 = arith.constant 0 : i32
    %41 = arith.cmpi eq, %arg1, %c0_i32_30 : i32
    %42 = arith.extui %41 : i1 to i32
    %c0_i32_31 = arith.constant 0 : i32
    %43 = arith.cmpi ne, %42, %c0_i32_31 : i32
    scf.if %43 {
      %c0_32 = arith.constant 0 : index
      %c0_33 = arith.constant 0 : index
      %44 = vector.load %arg10[%c0_32, %c0_33] : memref<1x128xf32, #tpu.memory_space<vmem>>, vector<1x128xf32>
      %c0_34 = arith.constant 0 : index
      %c0_35 = arith.constant 0 : index
      %45 = vector.load %arg9[%c0_34, %c0_35] : memref<1x128xf32, #tpu.memory_space<vmem>>, vector<1x128xf32>
      %cst_36 = arith.constant 0.000000e+00 : f32
      %46 = vector.broadcast %cst_36 : f32 to vector<1x128xf32>
      %47 = arith.subf %46, %45 : vector<1x128xf32>
      %48 = math.exp %47 : vector<1x128xf32>
      %cst_37 = arith.constant 1.200000e+02 : f32
      %49 = vector.broadcast %cst_37 : f32 to vector<1x128xf32>
      %50 = arith.mulf %49, %48 : vector<1x128xf32>
      %51 = arith.subf %44, %50 : vector<1x128xf32>
      %52 = math.log %51 : vector<1x128xf32>
      %53 = arith.addf %45, %52 : vector<1x128xf32>
      %c0_38 = arith.constant 0 : index
      %c0_39 = arith.constant 0 : index
      %54 = vector.load %arg11[%c0_38, %c0_39] : memref<1x128xf32, #tpu.memory_space<vmem>>, vector<1x128xf32>
      %c0_40 = arith.constant 0 : index
      %c0_41 = arith.constant 0 : index
      %55 = vector.load %arg6[%c0_40, %c0_41] : memref<1x128xf32, #tpu.memory_space<vmem>>, vector<1x128xf32>
      %56 = arith.subf %54, %55 : vector<1x128xf32>
      %c0_42 = arith.constant 0 : index
      %c0_43 = arith.constant 0 : index
      %57 = vector.load %arg12[%c0_42, %c0_43] : memref<1x128xf32, #tpu.memory_space<vmem>>, vector<1x128xf32>
      %cst_44 = arith.constant 1.000000e+00 : f32
      %58 = vector.broadcast %cst_44 : f32 to vector<1x128xf32>
      %59 = arith.subf %57, %58 : vector<1x128xf32>
      %cst_45 = arith.constant 1.000000e+00 : f32
      %60 = vector.broadcast %cst_45 : f32 to vector<1x128xf32>
      %61 = arith.maximumf %59, %60 : vector<1x128xf32>
      %62 = arith.mulf %59, %53 : vector<1x128xf32>
      %63 = arith.subf %56, %62 : vector<1x128xf32>
      %64 = arith.divf %63, %61 : vector<1x128xf32>
      %65 = vector.shape_cast %64 : vector<1x128xf32> to vector<1x1x128xf32>
      %c0_46 = arith.constant 0 : index
      %c0_47 = arith.constant 0 : index
      %c0_48 = arith.constant 0 : index
      %66 = vector.load %arg7[%c0_46, %c0_47, %c0_48] : memref<1x1x128xf32, #tpu.memory_space<vmem>>, vector<1x1x128xf32>
      tpu.vector_store %arg7[%c0_46, %c0_47, %c0_48], %65 {strides = array<i32>} : memref<1x1x128xf32, #tpu.memory_space<vmem>>, vector<1x1x128xf32>,
    } else {
    }
    return
  }
  func.func @transform_0(%arg0: i32, %arg1: i32) -> (i32, i32) {
    %c0_i32 = arith.constant 0 : i32
    %c0_i32_0 = arith.constant 0 : i32
    return %arg0, %c0_i32 : i32, i32
  }
  func.func @transform_1(%arg0: i32, %arg1: i32) -> (i32, i32) {
    %c0_i32 = arith.constant 0 : i32
    %c0_i32_0 = arith.constant 0 : i32
    return %arg1, %c0_i32 : i32, i32
  }
  func.func @transform_2(%arg0: i32, %arg1: i32) -> (i32, i32) {
    %c0_i32 = arith.constant 0 : i32
    %c0_i32_0 = arith.constant 0 : i32
    return %c0_i32, %arg0 : i32, i32
  }
  func.func @transform_3(%arg0: i32, %arg1: i32) -> (i32, i32) {
    %c0_i32 = arith.constant 0 : i32
    %c0_i32_0 = arith.constant 0 : i32
    return %arg1, %c0_i32 : i32, i32
  }
  func.func @transform_4(%arg0: i32, %arg1: i32) -> (i32, i32) {
    %c0_i32 = arith.constant 0 : i32
    %c0_i32_0 = arith.constant 0 : i32
    return %c0_i32, %arg0 : i32, i32
  }
  func.func @transform_5(%arg0: i32, %arg1: i32) -> (i32, i32, i32) {
    %c0_i32 = arith.constant 0 : i32
    %c0_i32_0 = arith.constant 0 : i32
    %c0_i32_1 = arith.constant 0 : i32
    return %arg0, %c0_i32, %c0_i32_0 : i32, i32, i32
  }
}

</mosaic_0001>

<bundles_post_ra>
// kernel: tpu_custom_call.1
= control target key start
LH: loop header
LB: loop body
LE: loop exit
PB: predicated region body
PF: predicated region fallthrough
CT: control target
= control target key end

     0   :  { %vm57_vm0 = vcmask 261120   ;;  %s1218_s0 = inlined_call_operand.vmem [shape: f32[128,32], index: 0, kind: input, shape index: {}]   ;;  %s1219_s1 = inlined_call_operand.vmem [shape: f32[128,32], index: 1, kind: input, shape index: {}]   ;;  %s1220_s2 = inlined_call_operand.vmem [shape: s32[1,128], index: 2, kind: input, shape index: {}]   ;;  %s1221_s3 = inlined_call_operand.vmem [shape: s32[128,1], index: 3, kind: input, shape index: {}]   ;;  %s1222_s4 = inlined_call_operand.vmem [shape: f32[1,128], index: 4, kind: input, shape index: {}]   ;;  %s1223_s5 = inlined_call_operand.hbm [shape: f32[1,1,128], index: 5, kind: output, shape index: {}]  }
   0x1   :  { %v40_v0 = vld [vmem:[%s1218_s0 + $0x78] sm:$0xff]  ;;  %v39_v1 = vld [vmem:[%s1218_s0 + $0x70] sm:$0xff]  ;;  %v38_v2 = vld [vmem:[%s1218_s0 + $0x68] sm:$0xff] }
   0x2   :  { %v56_v3 = vmul.f32 14.285714, %v40_v0  ;;  %v55_v4 = vmul.f32 14.285714, %v39_v1  ;;  %v54_v5 = vmul.f32 14.285714, %v38_v2 }
   0x3   :  { %v37_v6 = vld [vmem:[%s1218_s0 + $0x60] sm:$0xff]  ;;  %v36_v7 = vld [vmem:[%s1218_s0 + $0x58] sm:$0xff]  ;;  %v35_v8 = vld [vmem:[%s1218_s0 + $0x50] sm:$0xff] }
   0x4   :  { %73 = vst.msk [vmem:[#allocation2 + $0x78] sm:$0xff] %vm57_vm0, %v56_v3  ;;  %v53_v9 = vmul.f32 14.285714, %v37_v6  ;;  %v52_v10 = vmul.f32 14.285714, %v36_v7  ;;  %v34_v11 = vld [vmem:[%s1218_s0 + $0x48] sm:$0xff] }
   0x5   :  { %72 = vst.msk [vmem:[#allocation2 + $0x70] sm:$0xff] %vm57_vm0, %v55_v4  ;;  %v51_v12 = vmul.f32 14.285714, %v35_v8  ;;  %v33_v13 = vld [vmem:[%s1218_s0 + $0x40] sm:$0xff]  ;;  %v50_v14 = vmul.f32 14.285714, %v34_v11 }
   0x6   :  { %71 = vst.msk [vmem:[#allocation2 + $0x68] sm:$0xff] %vm57_vm0, %v54_v5  ;;  %v32_v15 = vld [vmem:[%s1218_s0 + $0x38] sm:$0xff]  ;;  %v31_v16 = vld [vmem:[%s1218_s0 + $0x30] sm:$0xff]  ;;  %v49_v17 = vmul.f32 14.285714, %v33_v13 }
   0x7   :  { %70 = vst.msk [vmem:[#allocation2 + $0x60] sm:$0xff] %vm57_vm0, %v53_v9  ;;  %v48_v18 = vmul.f32 14.285714, %v32_v15 }
   0x8   :  { %69 = vst.msk [vmem:[#allocation2 + $0x58] sm:$0xff] %vm57_vm0, %v52_v10 }
   0x9   :  { %10 = vsyncpa [#allocation8], 0  ;;  %68 = vst.msk [vmem:[#allocation2 + $0x50] sm:$0xff] %vm57_vm0, %v51_v12  ;;  %v47_v19 = vmul.f32 14.285714, %v31_v16  ;;  %v30_v20 = vld [vmem:[%s1218_s0 + $0x28] sm:$0xff] }
   0xa   :  { %67 = vst.msk [vmem:[#allocation2 + $0x48] sm:$0xff] %vm57_vm0, %v50_v14  ;;  %v46_v21 = vmul.f32 14.285714, %v30_v20  ;;  %v29_v24 = vld [vmem:[%s1218_s0 + $0x20] sm:$0xff]  ;;  %v28_v27 = vld [vmem:[%s1218_s0 + $0x18] sm:$0xff]  ;;  %v27_v30 = vld [vmem:[%s1218_s0 + $0x10] sm:$0xff] }
   0xb   :  { %v109_v22 = vld [vmem:[#allocation2 + $0x78] sm:$0xff]  ;;  %66 = vst.msk [vmem:[#allocation2 + $0x40] sm:$0xff] %vm57_vm0, %v49_v17  ;;  %v45_v25 = vmul.f32 14.285714, %v29_v24  ;;  %v44_v28 = vmul.f32 14.285714, %v28_v27 }
   0xc   :  { %590 = vmatpush.xpose.msk.msra.mxu0 %vm57_vm0, %v109_v22  ;;  %624 = vmatpush.xpose.msk.msra.mxu2 %vm57_vm0, %v109_v22  ;;  %65 = vst.msk [vmem:[#allocation2 + $0x38] sm:$0xff] %vm57_vm0, %v48_v18  ;;  %v108_v23 = vld [vmem:[#allocation2 + $0x70] sm:$0xff]  ;;  %v43_v31 = vmul.f32 14.285714, %v27_v30  ;;  %v272_v33 = vld [vmem:[%s1221_s3] sm:$0xff]  ;;  %v26_v34 = vld [vmem:[%s1218_s0 + $0x8] sm:$0xff] }
   0xd   :  { %625 = vmatpush.xpose.msk.msra.mxu3 %vm57_vm0, %v109_v22  ;;  %623 = vmatpush.xpose.msk.msra.mxu1 %vm57_vm0, %v109_v22  ;;  %64 = vst.msk [vmem:[#allocation2 + $0x30] sm:$0xff] %vm57_vm0, %v47_v19  ;;  %v107_v26 = vld [vmem:[#allocation2 + $0x68] sm:$0xff]  ;;  %v745_v35 = vmov 0   ;;  %v42_v36 = vmul.f32 14.285714, %v26_v34  ;;  %v25_v38 = vld [vmem:[%s1218_s0] sm:$0xff] }
   0xe   :  { %63 = vst.msk [vmem:[#allocation2 + $0x28] sm:$0xff] %vm57_vm0, %v46_v21  ;;  %v106_v29 = vld [vmem:[#allocation2 + $0x60] sm:$0xff]  ;;  %675 = vset.pattern.permute.xlu0 %v745_v35  ;;  %676 = vset.pattern.permute.xlu1 %v745_v35  ;;  %v41_v39 = vmul.f32 14.285714, %v25_v38  ;;  %v274_v41 = vld [vmem:[%s1221_s3 + $0x10] sm:$0xff]  ;;  %v273_v42 = vld [vmem:[%s1221_s3 + $0x8] sm:$0xff] }
   0xf   :  { %62 = vst.msk [vmem:[#allocation2 + $0x20] sm:$0xff] %vm57_vm0, %v45_v25  ;;  %v105_v32 = vld [vmem:[#allocation2 + $0x58] sm:$0xff]  ;;  %290 = vperm.xlu0 %675, %v272_v33   ;;  %677 = vset.pattern.permute.xlu2 %v745_v35  ;;  %v278_v46 = vld [vmem:[%s1221_s3 + $0x30] sm:$0xff]  ;;  %v281_v50 = vld [vmem:[%s1221_s3 + $0x48] sm:$0xff]  ;;  %v746_v17 = vmov 0.0   ;;  %s748_s12 = smov [#allocation7]  }
  0x10   :  { %591 = vmatpush.xpose.msk.msra.mxu0 %vm57_vm0, %v108_v23  ;;  %627 = vmatpush.xpose.msk.msra.mxu2 %vm57_vm0, %v108_v23  ;;  %61 = vst.msk [vmem:[#allocation2 + $0x18] sm:$0xff] %vm57_vm0, %v44_v28  ;;  %v104_v37 = vld [vmem:[#allocation2 + $0x50] sm:$0xff]  ;;  %v275_v45 = vld [vmem:[%s1221_s3 + $0x18] sm:$0xff]  ;;  %v284_v54 = vld [vmem:[%s1221_s3 + $0x60] sm:$0xff]  ;;  %s579_s13 = sshll.u32 %s748_s12, 4  ;;  %s581_s16 = sshll.u32 %s1223_s5, 4  ;;  %s580_s13 = int_to_ptr.vmem [resolvable:$true] %s579_s13  ;;  %s582_s16 = int_to_ptr.hbm [resolvable:$true] %s581_s16 }
  0x11   :  { %628 = vmatpush.xpose.msk.msra.mxu3 %vm57_vm0, %v108_v23  ;;  %626 = vmatpush.xpose.msk.msra.mxu1 %vm57_vm0, %v108_v23  ;;  %60 = vst.msk [vmem:[#allocation2 + $0x10] sm:$0xff] %vm57_vm0, %v43_v31  ;;  %v103_v40 = vld [vmem:[#allocation2 + $0x48] sm:$0xff]  ;;  %v279_v49 = vld [vmem:[%s1221_s3 + $0x38] sm:$0xff]  ;;  %v282_v53 = vld [vmem:[%s1221_s3 + $0x50] sm:$0xff] }
  0x12   :  { %59 = vst.msk [vmem:[#allocation2 + $0x8] sm:$0xff] %vm57_vm0, %v42_v36  ;;  %296 = vperm.xlu1 %676, %v274_v41   ;;  %v102_v43 = vld [vmem:[#allocation2 + $0x40] sm:$0xff]  ;;  %v285_v58 = vld [vmem:[%s1221_s3 + $0x68] sm:$0xff]  ;;  %v287_v61 = vld [vmem:[%s1221_s3 + $0x78] sm:$0xff] }
  0x13   :  { %58 = vst.msk [vmem:[#allocation2] sm:$0xff] %vm57_vm0, %v41_v39  ;;  %v101_v44 = vld [vmem:[#allocation2 + $0x38] sm:$0xff]  ;;  %v276_v55 = vld [vmem:[%s1221_s3 + $0x20] sm:$0xff]  ;;  %v277_v59 = vld [vmem:[%s1221_s3 + $0x28] sm:$0xff] }
  0x14   :  { %592 = vmatpush.xpose.msk.msra.mxu0 %vm57_vm0, %v107_v26  ;;  %630 = vmatpush.xpose.msk.msra.mxu2 %vm57_vm0, %v107_v26  ;;  %v100_v47 = vld [vmem:[#allocation2 + $0x30] sm:$0xff]  ;;  %v78_v62 = vld [vmem:[%s1219_s1] sm:$0xff]  ;;  %v79_v3 = vld [vmem:[%s1219_s1 + $0x8] sm:$0xff]  ;;  %75 = vst [vmem:[#allocation4] sm:$0x1] %v746_v17 }
  0x15   :  { %631 = vmatpush.xpose.msk.msra.mxu3 %vm57_vm0, %v107_v26  ;;  %629 = vmatpush.xpose.msk.msra.mxu1 %vm57_vm0, %v107_v26  ;;  %v99_v48 = vld [vmem:[#allocation2 + $0x28] sm:$0xff]  ;;  %v86_v63 = vld [vmem:[%s1219_s1 + $0x40] sm:$0xff]  ;;  %v283_v7 = vld [vmem:[%s1221_s3 + $0x58] sm:$0xff]  ;;  %76 = vst [vmem:[#allocation5] sm:$0x1] %v746_v17 }
  0x16   :  { %v98_v51 = vld [vmem:[#allocation2 + $0x20] sm:$0xff]  ;;  %302 = vperm.xlu2 %677, %v276_v55   ;;  %v87_v4 = vld [vmem:[%s1219_s1 + $0x48] sm:$0xff]  ;;  %v80_v8 = vld [vmem:[%s1219_s1 + $0x10] sm:$0xff]  ;;  %77 = vst [vmem:[#allocation6] sm:$0x1] %v746_v17 }
  0x17   :  { %293 = vperm.xlu0 %675, %v273_v42   ;;  %v97_v52 = vld [vmem:[#allocation2 + $0x18] sm:$0xff]  ;;  %v90_v0 = vld [vmem:[%s1219_s1 + $0x60] sm:$0xff]  ;;  %v91_v5 = vld [vmem:[%s1219_s1 + $0x68] sm:$0xff] }
  0x18   :  { %593 = vmatpush.xpose.msk.msra.mxu0 %vm57_vm0, %v106_v29  ;;  %633 = vmatpush.xpose.msk.msra.mxu2 %vm57_vm0, %v106_v29  ;;  %v96_v56 = vld [vmem:[#allocation2 + $0x10] sm:$0xff]  ;;  %v82_v1 = vld [vmem:[%s1219_s1 + $0x20] sm:$0xff]  ;;  %v83_v6 = vld [vmem:[%s1219_s1 + $0x28] sm:$0xff] }
  0x19   :  { %634 = vmatpush.xpose.msk.msra.mxu3 %vm57_vm0, %v106_v29  ;;  %632 = vmatpush.xpose.msk.msra.mxu1 %vm57_vm0, %v106_v29  ;;  %v95_v57 = vld [vmem:[#allocation2 + $0x8] sm:$0xff]  ;;  %v280_v2 = vld [vmem:[%s1221_s3 + $0x40] sm:$0xff]  ;;  %v88_v9 = vld [vmem:[%s1219_s1 + $0x50] sm:$0xff] }
  0x1a   :  { %299 = vperm.xlu1 %676, %v275_v45   ;;  %v94_v60 = vld [vmem:[#allocation2] sm:$0xff]  ;;  %v92_v10 = vld [vmem:[%s1219_s1 + $0x70] sm:$0xff]  ;;  %v81_v13 = vld [vmem:[%s1219_s1 + $0x18] sm:$0xff] }
  0x1b   :  { %v84_v11 = vld [vmem:[%s1219_s1 + $0x30] sm:$0xff]  ;;  %v89_v14 = vld [vmem:[%s1219_s1 + $0x58] sm:$0xff]  ;;  %v678_v19 = vld [vmem:[%s1220_s2] ss:$0 sm:$0xff] }
  0x1c   :  { %594 = vmatpush.xpose.msk.msra.mxu0 %vm57_vm0, %v105_v32  ;;  %636 = vmatpush.xpose.msk.msra.mxu2 %vm57_vm0, %v105_v32  ;;  %v286_v12 = vld [vmem:[%s1221_s3 + $0x70] sm:$0xff]  ;;  %v93_v15 = vld [vmem:[%s1219_s1 + $0x78] sm:$0xff] }
  0x1d   :  { %637 = vmatpush.xpose.msk.msra.mxu3 %vm57_vm0, %v105_v32  ;;  %635 = vmatpush.xpose.msk.msra.mxu1 %vm57_vm0, %v105_v32  ;;  %v85_v16 = vld [vmem:[%s1219_s1 + $0x38] sm:$0xff] }
  0x1e   :  { %305 = vperm.xlu2 %677, %v277_v59  }
  0x1f   :  { %308 = vperm.xlu0 %675, %v278_v46  }
  0x20   :  { %595 = vmatpush.xpose.msk.msra.mxu0 %vm57_vm0, %v104_v37  ;;  %639 = vmatpush.xpose.msk.msra.mxu2 %vm57_vm0, %v104_v37 }
  0x21   :  { %640 = vmatpush.xpose.msk.msra.mxu3 %vm57_vm0, %v104_v37  ;;  %638 = vmatpush.xpose.msk.msra.mxu1 %vm57_vm0, %v104_v37 }
  0x22   :  { %311 = vperm.xlu1 %676, %v279_v49  }
  0x24   :  { %596 = vmatpush.xpose.msk.msra.mxu0 %vm57_vm0, %v103_v40  ;;  %642 = vmatpush.xpose.msk.msra.mxu2 %vm57_vm0, %v103_v40 }
  0x25   :  { %643 = vmatpush.xpose.msk.msra.mxu3 %vm57_vm0, %v103_v40  ;;  %641 = vmatpush.xpose.msk.msra.mxu1 %vm57_vm0, %v103_v40 }
  0x26   :  { %314 = vperm.xlu2 %677, %v280_v2  }
  0x27   :  { %317 = vperm.xlu0 %675, %v281_v50  }
  0x28   :  { %597 = vmatpush.xpose.msk.msra.mxu0 %vm57_vm0, %v102_v43  ;;  %645 = vmatpush.xpose.msk.msra.mxu2 %vm57_vm0, %v102_v43 }
  0x29   :  { %646 = vmatpush.xpose.msk.msra.mxu3 %vm57_vm0, %v102_v43  ;;  %644 = vmatpush.xpose.msk.msra.mxu1 %vm57_vm0, %v102_v43 }
  0x2a   :  { %320 = vperm.xlu1 %676, %v282_v53  }
  0x2c   :  { %598 = vmatpush.xpose.msk.msra.mxu0 %vm57_vm0, %v101_v44  ;;  %648 = vmatpush.xpose.msk.msra.mxu2 %vm57_vm0, %v101_v44 }
  0x2d   :  { %649 = vmatpush.xpose.msk.msra.mxu3 %vm57_vm0, %v101_v44  ;;  %647 = vmatpush.xpose.msk.msra.mxu1 %vm57_vm0, %v101_v44 }
  0x2e   :  { %323 = vperm.xlu2 %677, %v283_v7  }
  0x2f   :  { %326 = vperm.xlu0 %675, %v284_v54  }
  0x30   :  { %599 = vmatpush.xpose.msk.msra.mxu0 %vm57_vm0, %v100_v47  ;;  %651 = vmatpush.xpose.msk.msra.mxu2 %vm57_vm0, %v100_v47 }
  0x31   :  { %652 = vmatpush.xpose.msk.msra.mxu3 %vm57_vm0, %v100_v47  ;;  %650 = vmatpush.xpose.msk.msra.mxu1 %vm57_vm0, %v100_v47 }
  0x32   :  { %329 = vperm.xlu1 %676, %v285_v58  }
  0x34   :  { %600 = vmatpush.xpose.msk.msra.mxu0 %vm57_vm0, %v99_v48  ;;  %654 = vmatpush.xpose.msk.msra.mxu2 %vm57_vm0, %v99_v48 }
  0x35   :  { %655 = vmatpush.xpose.msk.msra.mxu3 %vm57_vm0, %v99_v48  ;;  %653 = vmatpush.xpose.msk.msra.mxu1 %vm57_vm0, %v99_v48 }
  0x36   :  { %332 = vperm.xlu2 %677, %v286_v12  }
  0x37   :  { %335 = vperm.xlu0 %675, %v287_v61  }
  0x38   :  { %601 = vmatpush.xpose.msk.msra.mxu0 %vm57_vm0, %v98_v51  ;;  %657 = vmatpush.xpose.msk.msra.mxu2 %vm57_vm0, %v98_v51 }
  0x39   :  { %658 = vmatpush.xpose.msk.msra.mxu3 %vm57_vm0, %v98_v51  ;;  %656 = vmatpush.xpose.msk.msra.mxu1 %vm57_vm0, %v98_v51 }
  0x3c   :  { %602 = vmatpush.xpose.msk.msra.mxu0 %vm57_vm0, %v97_v52  ;;  %660 = vmatpush.xpose.msk.msra.mxu2 %vm57_vm0, %v97_v52 }
  0x3d   :  { %661 = vmatpush.xpose.msk.msra.mxu3 %vm57_vm0, %v97_v52  ;;  %659 = vmatpush.xpose.msk.msra.mxu1 %vm57_vm0, %v97_v52 }
  0x40   :  { %603 = vmatpush.xpose.msk.msra.mxu0 %vm57_vm0, %v96_v56  ;;  %663 = vmatpush.xpose.msk.msra.mxu2 %vm57_vm0, %v96_v56 }
  0x41   :  { %664 = vmatpush.xpose.msk.msra.mxu3 %vm57_vm0, %v96_v56  ;;  %662 = vmatpush.xpose.msk.msra.mxu1 %vm57_vm0, %v96_v56 }
  0x44   :  { %604 = vmatpush.xpose.msk.msra.mxu0 %vm57_vm0, %v95_v57  ;;  %666 = vmatpush.xpose.msk.msra.mxu2 %vm57_vm0, %v95_v57 }
  0x45   :  { %667 = vmatpush.xpose.msk.msra.mxu3 %vm57_vm0, %v95_v57  ;;  %665 = vmatpush.xpose.msk.msra.mxu1 %vm57_vm0, %v95_v57 }
  0x48   :  { %605 = vmatpush.xpose.msk.msra.mxu0 %vm57_vm0, %v94_v60  ;;  %669 = vmatpush.xpose.msk.msra.mxu2 %vm57_vm0, %v94_v60 }
  0x49   :  { %670 = vmatpush.xpose.msk.msra.mxu3 %vm57_vm0, %v94_v60  ;;  %668 = vmatpush.xpose.msk.msra.mxu1 %vm57_vm0, %v94_v60 }
  0x4b   :  { %606 = vmatmul.msk.f32.vlgmr.msra.gmra.mxu0 %vm57_vm0, %v78_v62  ;;  %614 = vmatmul.msk.f32.vlgmr.msra.gmra.mxu2 %vm57_vm0, %v86_v63 }
  0x4c   :  { %618 = vmatmul.msk.f32.vlgmr.msra.gmra.mxu3 %vm57_vm0, %v90_v0  ;;  %610 = vmatmul.msk.f32.vlgmr.msra.gmra.mxu1 %vm57_vm0, %v82_v1 }
  0x53   :  { %607 = vmatmul.msk.f32.gmra.mxu0 %vm57_vm0, %v79_v3  ;;  %615 = vmatmul.msk.f32.gmra.mxu2 %vm57_vm0, %v87_v4 }
  0x54   :  { %619 = vmatmul.msk.f32.gmra.mxu3 %vm57_vm0, %v91_v5  ;;  %611 = vmatmul.msk.f32.gmra.mxu1 %vm57_vm0, %v83_v6 }
  0x5b   :  { %608 = vmatmul.msk.f32.gmra.mxu0 %vm57_vm0, %v80_v8  ;;  %616 = vmatmul.msk.f32.gmra.mxu2 %vm57_vm0, %v88_v9 }
  0x5c   :  { %620 = vmatmul.msk.f32.gmra.mxu3 %vm57_vm0, %v92_v10  ;;  %612 = vmatmul.msk.f32.gmra.mxu1 %vm57_vm0, %v84_v11 }
  0x63   :  { %609 = vmatmul.msk.f32.gmra.mxu0 %vm57_vm0, %v81_v13  ;;  %617 = vmatmul.msk.f32.gmra.mxu2 %vm57_vm0, %v89_v14  ;;  %v513_v13 = vld [vmem:[#allocation6] sm:$0x1] }
  0x64   :  { %621 = vmatmul.msk.f32.gmra.mxu3 %vm57_vm0, %v93_v15  ;;  %613 = vmatmul.msk.f32.gmra.mxu1 %vm57_vm0, %v85_v16  ;;  %v747_v15 = vmov -inf  }
  0x65   :  { %74 = vst [vmem:[#allocation3] sm:$0x1] %v747_v15 }
  0x70   :  { %v303_v24 = vpop.permute.xlu2 %302 }
  0x71   :  { %vm342_vm4 = vcmp.eq.s32.totalorder %v303_v24, %v678_v19 }
  0x72   :  { %v1042_v33 = vsel %vm342_vm4, 1.0, %v746_v17 }
  0x78   :  { %v306_v30 = vpop.permute.xlu2 %305 }
  0x79   :  { %vm343_vm6 = vcmp.eq.s32.totalorder %v306_v30, %v678_v19 }
  0x7a   :  { %v1045_v34 = vsel %vm343_vm6, 1.0, %v746_v17 }
  0x80   :  { %v315_v40 = vpop.permute.xlu2 %314 }
  0x81   :  { %v291_v18 = vpop.permute.xlu0 %290  ;;  %vm346_vm9 = vcmp.eq.s32.totalorder %v315_v40, %v678_v19 }
  0x82   :  { %vm338_vm1 = vcmp.eq.s32.totalorder %v291_v18, %v678_v19  ;;  %v1058_v44 = vsel %vm346_vm9, 1.0, %v746_v17 }
  0x83   :  { %v1026_v22 = vsel %vm338_vm1, 1.0, %v746_v17 }
  0x84   :  { %v297_v21 = vpop.permute.xlu1 %296 }
  0x85   :  { %vm340_vm3 = vcmp.eq.s32.totalorder %v297_v21, %v678_v19 }
  0x86   :  { %v1034_v26 = vsel %vm340_vm3, 1.0, %v746_v17 }
  0x88   :  { %v324_v51 = vpop.permute.xlu2 %323 }
  0x89   :  { %v294_v20 = vpop.permute.xlu0 %293  ;;  %vm349_vm12 = vcmp.eq.s32.totalorder %v324_v51, %v678_v19 }
  0x8a   :  { %vm339_vm2 = vcmp.eq.s32.totalorder %v294_v20, %v678_v19  ;;  %v1070_v53 = vsel %vm349_vm12, 1.0, %v746_v17 }
  0x8b   :  { %v1029_v23 = vsel %vm339_vm2, 1.0, %v746_v17 }
  0x8c   :  { %v514_v25 = vadd.f32 %v1029_v23, %v1026_v22  ;;  %v300_v28 = vpop.permute.xlu1 %299 }
  0x8d   :  { %vm341_vm5 = vcmp.eq.s32.totalorder %v300_v28, %v678_v19 }
  0x8e   :  { %v515_v27 = vadd.f32 %v514_v25, %v1034_v26  ;;  %v1038_v31 = vsel %vm341_vm5, 1.0, %v746_v17 }
  0x90   :  { %v516_v32 = vadd.f32 %v515_v27, %v1038_v31  ;;  %v333_v58 = vpop.permute.xlu2 %332 }
  0x91   :  { %v309_v29 = vpop.permute.xlu0 %308  ;;  %vm352_vm15 = vcmp.eq.s32.totalorder %v333_v58, %v678_v19 }
  0x92   :  { %vm344_vm7 = vcmp.eq.s32.totalorder %v309_v29, %v678_v19  ;;  %v517_v35 = vadd.f32 %v516_v32, %v1042_v33  ;;  %v1082_v61 = vsel %vm352_vm15, 1.0, %v746_v17 }
  0x93   :  { %v1049_v36 = vsel %vm344_vm7, 1.0, %v746_v17 }
  0x94   :  { %v518_v37 = vadd.f32 %v517_v35, %v1045_v34  ;;  %v312_v38 = vpop.permute.xlu1 %311 }
  0x95   :  { %vm345_vm8 = vcmp.eq.s32.totalorder %v312_v38, %v678_v19 }
  0x96   :  { %v519_v39 = vadd.f32 %v518_v37, %v1049_v36  ;;  %v1054_v41 = vsel %vm345_vm8, 1.0, %v746_v17 }
  0x98   :  { %v520_v43 = vadd.f32 %v519_v39, %v1054_v41 }
  0x99   :  { %v318_v42 = vpop.permute.xlu0 %317 }
  0x9a   :  { %vm347_vm10 = vcmp.eq.s32.totalorder %v318_v42, %v678_v19  ;;  %v521_v45 = vadd.f32 %v520_v43, %v1058_v44 }
  0x9b   :  { %v1062_v46 = vsel %vm347_vm10, 1.0, %v746_v17 }
  0x9c   :  { %v522_v47 = vadd.f32 %v521_v45, %v1062_v46  ;;  %v321_v48 = vpop.permute.xlu1 %320 }
  0x9d   :  { %vm348_vm11 = vcmp.eq.s32.totalorder %v321_v48, %v678_v19 }
  0x9e   :  { %v1066_v49 = vsel %vm348_vm11, 1.0, %v746_v17 }
  0x9f   :  { %v523_v50 = vadd.f32 %v522_v47, %v1066_v49 }
  0xa1   :  { %v327_v52 = vpop.permute.xlu0 %326  ;;  %v524_v54 = vadd.f32 %v523_v50, %v1070_v53 }
  0xa2   :  { %vm350_vm13 = vcmp.eq.s32.totalorder %v327_v52, %v678_v19 }
  0xa3   :  { %v1074_v56 = vsel %vm350_vm13, 1.0, %v746_v17 }
  0xa4   :  { %v330_v55 = vpop.permute.xlu1 %329  ;;  %v525_v57 = vadd.f32 %v524_v54, %v1074_v56 }
  0xa5   :  { %vm351_vm14 = vcmp.eq.s32.totalorder %v330_v55, %v678_v19 }
  0xa6   :  { %v1078_v59 = vsel %vm351_vm14, 1.0, %v746_v17 }
  0xa7   :  { %v526_v60 = vadd.f32 %v525_v57, %v1078_v59 }
  0xa9   :  { %v527_v62 = vadd.f32 %v526_v60, %v1082_v61  ;;  %v336_v63 = vpop.permute.xlu0 %335 }
  0xaa   :  { %vm353_vm0 = vcmp.eq.s32.totalorder %v336_v63, %v678_v19 }
  0xab   :  { %v1086_v0 = vsel %vm353_vm0, 1.0, %v746_v17 }
  0xac   :  { %v528_v1 = vadd.f32 %v527_v62, %v1086_v0 }
  0xae   :  { %v529_v4 = vrot.slane %v528_v1, 4 }
  0xb0   :  { %v530_v5 = vadd.f32 %v529_v4, %v528_v1 }
  0xb2   :  { %v531_v6 = vrot.slane %v530_v5, 2 }
  0xb4   :  { %v532_v9 = vadd.f32 %v531_v6, %v530_v5 }
  0xb6   :  { %v533_v12 = vrot.slane %v532_v9, 1 }
  0xb8   :  { %v534_v14 = vadd.f32 %v533_v12, %v532_v9 }
  0xba   :  { %v535_v16 = vadd.f32 %v534_v14, %v513_v13 }
  0xbc   :  { %536 = vst [vmem:[#allocation6] sm:$0x1] %v535_v16 }
  0xc8   :  { %v1089_v2 = vpop.f32.mrf.mxu0 }
  0xc9   :  { %v1091_v3 = vpop.f32.mrf.mxu1  ;;  %v474_v24 = vmul.f32 %v1026_v22, %v1089_v2 }
  0xca   :  { %v371_v32 = vmax.f32 %v1089_v2, %v1091_v3  ;;  %v478_v38 = vmul.f32 %v1042_v33, %v1091_v3 }
  0xce   :  { %v1093_v7 = vpop.f32.mrf.mxu2 }
  0xcf   :  { %v1095_v8 = vpop.f32.mrf.mxu3  ;;  %v375_v43 = vmax.f32 %v371_v32, %v1093_v7  ;;  %v482_v62 = vmul.f32 %v1058_v44, %v1093_v7  ;;  %v1167_v32 = vld [vmem:[#allocation3] sm:$0x1] }
  0xd0   :  { %v1097_v10 = vpop.f32.mrf.mxu0  ;;  %v486_v44 = vmul.f32 %v1074_v56, %v1095_v8 }
  0xd1   :  { %v1099_v11 = vpop.f32.mrf.mxu1  ;;  %v475_v21 = vmul.f32 %v1029_v23, %v1097_v10  ;;  %v379_v55 = vmax.f32 %v375_v43, %v1095_v8 }
  0xd2   :  { %v372_v29 = vmax.f32 %v1097_v10, %v1099_v11  ;;  %v479_v45 = vmul.f32 %v1045_v34, %v1099_v11 }
  0xd3   :  { %v490_v28 = vadd.f32 %v475_v21, %v474_v24 }
  0xd6   :  { %v1101_v17 = vpop.f32.mrf.mxu2 }
  0xd7   :  { %v1103_v18 = vpop.f32.mrf.mxu3  ;;  %v376_v39 = vmax.f32 %v372_v29, %v1101_v17  ;;  %v483_v4 = vmul.f32 %v1062_v46, %v1101_v17 }
  0xd8   :  { %v1105_v19 = vpop.f32.mrf.mxu0  ;;  %v487_v46 = vmul.f32 %v1078_v59, %v1103_v18 }
  0xd9   :  { %v1107_v20 = vpop.f32.mrf.mxu1  ;;  %v476_v25 = vmul.f32 %v1034_v26, %v1105_v19  ;;  %v380_v50 = vmax.f32 %v376_v39, %v1103_v18 }
  0xda   :  { %v373_v22 = vmax.f32 %v1105_v19, %v1107_v20  ;;  %v480_v33 = vmul.f32 %v1049_v36, %v1107_v20 }
  0xdb   :  { %v491_v23 = vadd.f32 %v490_v28, %v476_v25  ;;  %v383_v63 = vmax.f32 %v379_v55, %v380_v50 }
  0xde   :  { %v1115_v27 = vpop.f32.mrf.mxu2 }
  0xdf   :  { %v1119_v30 = vpop.f32.mrf.mxu3  ;;  %v377_v47 = vmax.f32 %v373_v22, %v1115_v27  ;;  %v484_v9 = vmul.f32 %v1066_v49, %v1115_v27 }
  0xe0   :  { %v1123_v35 = vpop.f32.mrf.mxu0  ;;  %v488_v49 = vmul.f32 %v1082_v61, %v1119_v30 }
  0xe1   :  { %v477_v26 = vmul.f32 %v1038_v31, %v1123_v35  ;;  %v1129_v37 = vpop.f32.mrf.mxu1  ;;  %v381_v57 = vmax.f32 %v377_v47, %v1119_v30 }
  0xe2   :  { %v374_v42 = vmax.f32 %v1123_v35, %v1129_v37  ;;  %v481_v34 = vmul.f32 %v1054_v41, %v1129_v37 }
  0xe3   :  { %v492_v40 = vadd.f32 %v491_v23, %v477_v26 }
  0xe5   :  { %v493_v48 = vadd.f32 %v492_v40, %v478_v38 }
  0xe6   :  { %v1140_v31 = vpop.f32.mrf.mxu2 }
  0xe7   :  { %v494_v51 = vadd.f32 %v493_v48, %v479_v45  ;;  %v378_v52 = vmax.f32 %v374_v42, %v1140_v31  ;;  %v1146_v54 = vpop.f32.mrf.mxu3  ;;  %v485_v41 = vmul.f32 %v1070_v53, %v1140_v31 }
  0xe8   :  { %v489_v56 = vmul.f32 %v1086_v0, %v1146_v54 }
  0xe9   :  { %v495_v58 = vadd.f32 %v494_v51, %v480_v33  ;;  %v382_v60 = vmax.f32 %v378_v52, %v1146_v54 }
  0xeb   :  { %v496_v36 = vadd.f32 %v495_v58, %v481_v34  ;;  %v384_v1 = vmax.f32 %v381_v57, %v382_v60 }
  0xed   :  { %v497_v5 = vadd.f32 %v496_v36, %v482_v62  ;;  %v385_v6 = vmax.f32 %v383_v63, %v384_v1  ;;  %v473_v63 = vld [vmem:[#allocation5] sm:$0x1] }
  0xef   :  { %v498_v12 = vadd.f32 %v497_v5, %v483_v4  ;;  %v386_v13 = vrot.slane %v385_v6, 4 }
  0xf1   :  { %v499_v14 = vadd.f32 %v498_v12, %v484_v9  ;;  %v387_v15 = vmax.f32 %v385_v6, %v386_v13 }
  0xf3   :  { %v500_v16 = vadd.f32 %v499_v14, %v485_v41  ;;  %v388_v21 = vrot.slane %v387_v15, 2 }
  0xf5   :  { %v501_v24 = vadd.f32 %v500_v16, %v486_v44  ;;  %v389_v25 = vmax.f32 %v387_v15, %v388_v21 }
  0xf7   :  { %v390_v28 = vrot.slane %v389_v25, 1  ;;  %v502_v29 = vadd.f32 %v501_v24, %v487_v46 }
  0xf9   :  { %v391_v53 = vmax.f32 %v389_v25, %v390_v28  ;;  %v503_v23 = vadd.f32 %v502_v29, %v488_v49 }
  0xfb   :  { %v1170_v22 = vmax.f32 %v1167_v32, %v391_v53  ;;  %v504_v59 = vadd.f32 %v503_v23, %v489_v56 }
  0xfd   :  { %v1175_v26 = vperm.slane %v1170_v22, 0  ;;  %472 = vst [vmem:[#allocation3] sm:$0x1] %v1170_v22  ;;  %v505_v40 = vrot.slane %v504_v59, 4 }
  0xff   :  { %v401_v61 = vsub.f32 %v1089_v2, %v1175_v26  ;;  %v402_v38 = vsub.f32 %v1097_v10, %v1175_v26  ;;  %v403_v39 = vsub.f32 %v1105_v19, %v1175_v26  ;;  %v404_v42 = vsub.f32 %v1123_v35, %v1175_v26 }
 0x100   :  { %v405_v45 = vsub.f32 %v1091_v3, %v1175_v26  ;;  %v506_v48 = vadd.f32 %v505_v40, %v504_v59  ;;  %v406_v2 = vsub.f32 %v1099_v11, %v1175_v26  ;;  %v407_v19 = vsub.f32 %v1107_v20, %v1175_v26 }
 0x101   :  { %v417_v0 = vmul.f32 1.442695, %v401_v61  ;;  %v419_v43 = vmul.f32 1.442695, %v402_v38  ;;  %v421_v47 = vmul.f32 1.442695, %v403_v39  ;;  %v408_v35 = vsub.f32 %v1129_v37, %v1175_v26 }
 0x102   :  { %v423_v10 = vmul.f32 1.442695, %v404_v42  ;;  %v425_v50 = vmul.f32 1.442695, %v405_v45  ;;  %v507_v33 = vrot.slane %v506_v48, 2  ;;  %v409_v57 = vsub.f32 %v1093_v7, %v1175_v26 }
 0x103   :  { %679 = vpow2.f32 %v417_v0  ;;  %v427_v51 = vmul.f32 1.442695, %v406_v2  ;;  %v429_v11 = vmul.f32 1.442695, %v407_v19  ;;  %v410_v20 = vsub.f32 %v1101_v17, %v1175_v26 }
 0x104   :  { %681 = vpow2.f32 %v419_v43  ;;  %v508_v52 = vadd.f32 %v507_v33, %v506_v48  ;;  %v431_v62 = vmul.f32 1.442695, %v408_v35  ;;  %v411_v4 = vsub.f32 %v1115_v27, %v1175_v26 }
 0x105   :  { %683 = vpow2.f32 %v421_v47  ;;  %v433_v5 = vmul.f32 1.442695, %v409_v57  ;;  %v412_v12 = vsub.f32 %v1140_v31, %v1175_v26  ;;  %v435_v13 = vmul.f32 1.442695, %v410_v20 }
 0x106   :  { %685 = vpow2.f32 %v423_v10  ;;  %v509_v58 = vrot.slane %v508_v52, 1  ;;  %v413_v14 = vsub.f32 %v1095_v8, %v1175_v26  ;;  %v437_v15 = vmul.f32 1.442695, %v411_v4  ;;  %v553_v10 = vld [vmem:[#allocation6] sm:$0x1] }
 0x107   :  { %687 = vpow2.f32 %v425_v50  ;;  %v414_v16 = vsub.f32 %v1103_v18, %v1175_v26  ;;  %v439_v21 = vmul.f32 1.442695, %v412_v12  ;;  %v415_v31 = vsub.f32 %v1119_v30, %v1175_v26  ;;  %v541_v50 = vld [vmem:[#allocation3] sm:$0x1] }
 0x108   :  { %689 = vpow2.f32 %v427_v51  ;;  %v510_v36 = vadd.f32 %v509_v58, %v508_v52  ;;  %v441_v25 = vmul.f32 1.442695, %v413_v14  ;;  %v416_v8 = vsub.f32 %v1146_v54, %v1175_v26 }
 0x109   :  { %v680_v3 = vpop.eup %679  ;;  %691 = vpow2.f32 %v429_v11  ;;  %v443_v29 = vmul.f32 1.442695, %v414_v16  ;;  %v445_v18 = vmul.f32 1.442695, %v415_v31  ;;  %v393_v54 = vsub.f32 %v1167_v32, %v1170_v22  ;;  %v396_v11 = vld [vmem:[#allocation4] sm:$0x1] }
 0x10a   :  { %v682_v55 = vpop.eup %681  ;;  %v511_v6 = vadd.f32 %v510_v36, %v473_v63  ;;  %693 = vpow2.f32 %v431_v62  ;;  %v447_v61 = vmul.f32 1.442695, %v416_v8  ;;  %v622_v35 = vadd.f32 -1.0, %v553_v10 }
 0x10b   :  { %v449_v34 = vadd.f32 %v682_v55, %v680_v3  ;;  %v684_v60 = vpop.eup %683  ;;  %695 = vpow2.f32 %v433_v5  ;;  %v394_v48 = vmul.f32 1.442695, %v393_v54  ;;  %v542_v51 = vsub.f32 0.0, %v541_v50 }
 0x10c   :  { %v686_v1 = vpop.eup %685  ;;  %512 = vst [vmem:[#allocation5] sm:$0x1] %v511_v6  ;;  %697 = vpow2.f32 %v435_v13  ;;  %v555_v55 = vmax.f32 %v622_v35, 1.0 }
 0x10d   :  { %v450_v37 = vadd.f32 %v684_v60, %v449_v34  ;;  %v688_v9 = vpop.eup %687  ;;  %699 = vpow2.f32 %v437_v15  ;;  %v543_v34 = vmul.f32 1.442695, %v542_v51 }
 0x10e   :  { %v690_v41 = vpop.eup %689  ;;  %701 = vpow2.f32 %v439_v21  ;;  %vm563_vm1 = vweird.f32 %v555_v55  ;;  %v569_v6 = vand.u32 2147483648, %v555_v55  ;;  %v567_v13 = vand.u32 2147483647, %v555_v55 }
 0x10f   :  { %v451_v7 = vadd.f32 %v686_v1, %v450_v37  ;;  %v692_v27 = vpop.eup %691  ;;  %703 = vpow2.f32 %v441_v25 }
 0x110   :  { %v694_v24 = vpop.eup %693  ;;  %705 = vpow2.f32 %v443_v29  ;;  %v570_v15 = vor.u32 1.1754944e-38, %v569_v6  ;;  %vm568_vm4 = vcmp.eq.f32.partialorder %v567_v13, 8.507059e+37 }
 0x111   :  { %v452_v17 = vadd.f32 %v688_v9, %v451_v7  ;;  %v696_v28 = vpop.eup %695  ;;  %707 = vpow2.f32 %v445_v18 }
 0x112   :  { %v698_v23 = vpop.eup %697  ;;  %709 = vpow2.f32 %v447_v61 }
 0x113   :  { %v453_v44 = vadd.f32 %v690_v41, %v452_v17  ;;  %v700_v59 = vpop.eup %699  ;;  %711 = vpow2.f32 %v394_v48  ;;  %v550_v17 = vld [vmem:[#allocation5] sm:$0x1]  ;;  %v551_v41 = vld [vmem:[%s1222_s4] sm:$0x1] }
 0x114   :  { %v702_v39 = vpop.eup %701  ;;  %713 = vrcp.f32 %v555_v55 }
 0x115   :  { %v454_v46 = vadd.f32 %v692_v27, %v453_v44  ;;  %v704_v40 = vpop.eup %703  ;;  %715 = vpow2.f32 %v543_v34  ;;  %v552_v44 = vsub.f32 %v550_v17, %v551_v41 }
 0x116   :  { %v706_v0 = vpop.eup %705 }
 0x117   :  { %v455_v49 = vadd.f32 %v694_v24, %v454_v46  ;;  %v708_v43 = vpop.eup %707 }
 0x118   :  { %v710_v47 = vpop.eup %709 }
 0x119   :  { %v456_v53 = vadd.f32 %v696_v28, %v455_v49  ;;  %v712_v57 = vpop.eup %711 }
 0x11a   :  { %v397_v22 = vmul.f32 %v712_v57, %v396_v11  ;;  %v714_v20 = vpop.eup %713 }
 0x11b   :  { %v457_v56 = vadd.f32 %v698_v23, %v456_v53  ;;  %v716_v62 = vpop.eup %715  ;;  %v559_v63 = vmul.f32 %v714_v20, %v555_v55  ;;  %vm564_vm2 = vweird.f32 %v714_v20 }
 0x11c   :  { %v545_v37 = vmul.f32 120.0, %v716_v62  ;;  %vm565_vm3 = vmor %vm563_vm1, %vm564_vm2 }
 0x11d   :  { %v458_v38 = vadd.f32 %v700_v59, %v457_v56  ;;  %v560_v4 = vsub.f32 1.0, %v559_v63 }
 0x11f   :  { %v459_v30 = vadd.f32 %v702_v39, %v458_v38  ;;  %v561_v5 = vmul.f32 %v714_v20, %v560_v4 }
 0x121   :  { %v460_v42 = vadd.f32 %v704_v40, %v459_v30  ;;  %v562_v12 = vadd.f32 %v714_v20, %v561_v5 }
 0x123   :  { %v461_v26 = vadd.f32 %v706_v0, %v460_v42  ;;  %v566_v16 = vsel %vm565_vm3, %v714_v20, %v562_v12 }
 0x124   :  { %v571_v46 = vsel %vm568_vm4, %v570_v15, %v566_v16 }
 0x125   :  { %v462_v45 = vadd.f32 %v708_v43, %v461_v26 }
 0x127   :  { %v463_v2 = vadd.f32 %v710_v47, %v462_v45 }
 0x129   :  { %v464_v19 = vrot.slane %v463_v2, 4 }
 0x12b   :  { %v465_v33 = vadd.f32 %v464_v19, %v463_v2 }
 0x12d   :  { %v466_v3 = vrot.slane %v465_v33, 2 }
 0x12f   :  { %v467_v52 = vadd.f32 %v466_v3, %v465_v33 }
 0x131   :  { %v468_v32 = vrot.slane %v467_v52, 1 }
 0x133   :  { %v469_v58 = vadd.f32 %v468_v32, %v467_v52 }
 0x135   :  { %v470_v60 = vadd.f32 %v469_v58, %v397_v22 }
 0x137   :  { %471 = vst [vmem:[#allocation4] sm:$0x1] %v470_v60 }
 0x13e   :  { %v540_v36 = vld [vmem:[#allocation4] sm:$0x1] }
 0x13f   :  { %v546_v1 = vsub.f32 %v540_v36, %v545_v37 }
 0x141   :  { %717 = vlog2.f32 %v546_v1 }
 0x147   :  { %v718_v7 = vpop.eup %717 }
 0x148   :  { %v548_v9 = vmul.f32 0.6931472, %v718_v7 }
 0x14a   :  { %v549_v14 = vadd.f32 %v548_v9, %v541_v50 }
 0x14c   :  { %v556_v27 = vmul.f32 %v622_v35, %v549_v14 }
 0x14e   :  { %v557_v21 = vsub.f32 %v552_v44, %v556_v27 }
 0x150   :  { %v572_v24 = vmul.f32 %v571_v46, %v557_v21 }
 0x152   :  { %573 = vst [vmem:[#allocation7] sm:$0x1] %v572_v24 }
 0x153   :  { %584 = dma.vmem_to_hbm [thread:$0]  %s580_s13, 16, %s582_s16, [#allocation8]  }
 0x154   :  { %743 = dma.done.wait [#allocation8], 16  }
 0x155   :  { %744 = vsyncadd [#allocation8], 4294967280 }
 0x156   :  { %589 = vsyncpa [#allocation8], 1 }

</bundles_post_ra>
